<compile_context>
chip_gen: v7x
topology: tpu7x:2x2x1
jax: 0.10.0
libtpu: 0.0.40
codegen_flags: <defaults>
</compile_context>

<pallas_src>
from functools import partial

import jax
import jax.numpy as jnp
from jax.experimental import pallas as pl
from jax.experimental.pallas import tpu as pltpu


# ----------------------------------------------------------------------------------------
# Small host-side helpers
# ----------------------------------------------------------------------------------------

def _round_up(n, m):
    return ((n + m - 1) // m) * m


_ROLL_MODE_CACHE = None


def _roll_mode():
    """Determine pltpu.roll's rotation convention once (cached), with a safe fallback.

    Returns "jnp"  if pltpu.roll(x, shift, 0)[i] == x[(i - shift) % n]  (jnp.roll convention),
            "inv"  if pltpu.roll(x, shift, 0)[i] == x[(i + shift) % n],
            "slice" if roll is unavailable (kernel then uses plain slices).
    """
    global _ROLL_MODE_CACHE
    if _ROLL_MODE_CACHE is not None:
        return _ROLL_MODE_CACHE
    try:
        def probe(o_ref):
            rows = jax.lax.broadcasted_iota(jnp.float32, (8, 128), 0)
            o_ref[...] = pltpu.roll(rows, shift=1, axis=0)

        v = pl.pallas_call(
            probe, out_shape=jax.ShapeDtypeStruct((8, 128), jnp.float32))()
        v00 = float(v[0, 0])
        if v00 == 7.0:
            _ROLL_MODE_CACHE = "jnp"
        elif v00 == 1.0:
            _ROLL_MODE_CACHE = "inv"
        else:
            _ROLL_MODE_CACHE = "slice"
    except Exception:
        _ROLL_MODE_CACHE = "slice"
    return _ROLL_MODE_CACHE


def _vmem_limit_bytes():
    """Explicit scoped-VMEM limit: 3/4 of physical with >=12 MiB headroom, never None."""
    phys = 64 << 20                       # conservative default = v7x per-core VMEM
    try:
        phys = int(pltpu.get_tpu_info().vmem_capacity_bytes)
    except Exception:
        pass
    return int(max(min(phys * 3 // 4, phys - (12 << 20)), 16 << 20))


def _pick_tile_t(T, C, K, io_itemsize, vmem_limit_bytes, weight_bytes):
    """VMEM- and generation-aware time-tile size (multiple of 256/128/8, fits the budget)."""
    pad = K - 1
    hist_rows = _round_up(max(pad, 1), 8)
    # tile-proportional VMEM per time row: double-buffered in/out blocks + ~14 live f32 slabs
    per_row = 4 * C * io_itemsize + 14 * 4 * C
    budget = max(vmem_limit_bytes - 2 * weight_bytes - (4 << 20), 1 << 20)
    cap = max(int(budget // per_row), 8)
    t_full = _round_up(T, 8)
    tile = min(cap, t_full, 2048)
    for m in (256, 128, 8):               # 256 fills the v6e/v7x MXU, 128 fills v5e
        if tile >= m:
            tile = (tile // m) * m
            break
    if tile < t_full:                     # multiple time tiles -> must hold the causal halo
        tile = max(tile, hist_rows)
    return max(tile, 8)


# ----------------------------------------------------------------------------------------
# Kernel
# ----------------------------------------------------------------------------------------

def conformer_conv_kernel(
    x_ref,        # (1, tile_t, C)   input activations (any float dtype)
    w1_ref,       # (C, 2C)  bf16, LN-gamma folded in
    b1_ref,       # (1, 2C)  f32,  LN-beta folded in
    dw_ref,       # (K, C)   f32,  BN scale folded in
    bn_t_ref,     # (1, C)   f32,  BN shift
    w2_ref,       # (C, C)   bf16
    b2_ref,       # (1, C)   f32
    o_ref,        # (1, tile_t, C)
    hist_ref,     # scratch (hist_rows, C) f32 — causal halo carried across time tiles
    *,
    kernel_size: int,
    tile_t: int,
    n_sub: int,
    hist_rows: int,
    ln_eps: float,
    update_carry: bool,
    roll_mode: str,
):
    K = kernel_size
    pad = K - 1
    C = o_ref.shape[2]
    sub_t = tile_t // n_sub
    off = hist_rows - pad                     # offset of the first causal tap inside `ext`
    ext_rows = hist_rows + sub_t

    # Correctness of the carried halo requires the TIME axis to be the innermost,
    # sequentially iterated ("arbitrary") grid axis.  Batch may be "parallel": the scratch
    # is per-core and every batch element restarts the carry at t == 0 below.
    if pad > 0:
        @pl.when(pl.program_id(1) == 0)
        def _():
            hist_ref[...] = jnp.zeros_like(hist_ref)   # causal left padding is zeros

    w1 = w1_ref[...]
    b1 = b1_ref[0]
    dw = dw_ref[...]
    bn_t = bn_t_ref[0]
    w2 = w2_ref[...]
    b2 = b2_ref[0]

    halo = hist_ref[...] if pad > 0 else None

    def window(ext, s):
        # ext[s : s + sub_t] without a misaligned sublane slice: XLU rotate + aligned slice.
        if s == 0:
            return ext[:sub_t]
        if roll_mode == "jnp":          # out[i] = ext[(i - shift) % n]  (jnp.roll convention)
            return pltpu.roll(ext, shift=ext_rows - s, axis=0)[:sub_t]
        if roll_mode == "inv":          # out[i] = ext[(i + shift) % n]
            return pltpu.roll(ext, shift=s, axis=0)[:sub_t]
        return ext[s:s + sub_t]         # fallback: plain (misaligned) slice

    # Two statically-unrolled sub-chunks so the LLO can overlap PW2 (MXU) of chunk c with
    # the LN / GLU / depthwise / Swish (VPU + EUP) work of chunk c+1.
    for c in range(n_sub):
        r0 = c * sub_t

        # ---- LayerNorm over channels (two-pass stats; gamma/beta folded into W1/b1) ----
        x = x_ref[0, r0:r0 + sub_t, :].astype(jnp.float32)      # (sub_t, C)
        mu = jnp.mean(x, axis=-1, keepdims=True)
        xc = x - mu
        var = jnp.mean(xc * xc, axis=-1, keepdims=True)
        xn = xc * jax.lax.rsqrt(var + ln_eps)

        # ---- Fused pointwise conv #1 (C -> 2C) + GLU; bf16 MXU operands, f32 accumulate ----
        pre = jnp.dot(xn.astype(jnp.bfloat16), w1,
                      preferred_element_type=jnp.float32) + b1
        glu = pre[:, :C] * jax.nn.sigmoid(pre[:, C:])            # (sub_t, C) f32

        # ---- Causal depthwise conv over time (BN scale folded in; BN shift seeds acc) ----
        if pad > 0:
            # (hist_rows + sub_t, C), both parts 8-row aligned.
            ext = jnp.concatenate([halo, glu], axis=0)
            acc = bn_t + window(ext, off) * dw[0]
            for j in range(1, K):                                # small static unroll
                s = off + j
                win = glu if s == hist_rows else window(ext, s)
                acc = acc + win * dw[j]
            if c < n_sub - 1 or update_carry:
                # Last hist_rows rows of this chunk's GLU feed the next chunk's window.
                halo = glu[sub_t - hist_rows:, :]                # aligned slice
        else:
            acc = bn_t + glu * dw[0]

        # ---- Swish ----
        y = acc * jax.nn.sigmoid(acc)

        # ---- Pointwise conv #2 (C -> C), bf16 MXU operands ----
        out = jnp.dot(y.astype(jnp.bfloat16), w2,
                      preferred_element_type=jnp.float32) + b2
        o_ref[0, r0:r0 + sub_t, :] = out.astype(o_ref.dtype)

    if pad > 0 and update_carry:
        hist_ref[...] = halo


# ----------------------------------------------------------------------------------------
# Wrapper
# ----------------------------------------------------------------------------------------

def conformer_conv_module(x, folded, *, kernel_size, tile_t=None, ln_eps=1e-5):
    """x: (B, T, C) -> (B, T, C).  `folded` comes from fold_params().  Output dtype == x dtype."""
    B, T, C = x.shape
    K = kernel_size
    pad = K - 1
    hist_rows = _round_up(max(pad, 1), 8)

    vmem_limit = _vmem_limit_bytes()
    weight_bytes = sum(int(a.size) * a.dtype.itemsize for a in folded.values())
    if tile_t is None:
        tile_t = _pick_tile_t(T, C, K, x.dtype.itemsize, vmem_limit, weight_bytes)
    assert tile_t % 8 == 0, "tile_t must be a multiple of 8 (sublane alignment)"

    # Non-divisor T: zero-pad the time axis on the host (causal conv -> padded tail cannot
    # influence real outputs) and slice back afterwards.
    T_pad = _round_up(T, tile_t)
    nt = T_pad // tile_t
    if nt > 1:
        assert tile_t >= hist_rows, "tile_t must cover the (8-row rounded) causal halo"
    n_sub = 2 if (tile_t % 16 == 0 and tile_t // 2 >= hist_rows) else 1

    x_in = x if T_pad == T else jnp.pad(x, ((0, 0), (0, T_pad - T), (0, 0)))

    roll_mode = _roll_mode() if pad > 0 else "slice"

    kern = partial(conformer_conv_kernel, kernel_size=K, tile_t=tile_t, n_sub=n_sub,
                   hist_rows=hist_rows, ln_eps=ln_eps, update_carry=(nt > 1),
                   roll_mode=roll_mode)

    weight_args = (folded["w1"], folded["b1"], folded["dw"],
                   folded["bn_t"], folded["w2"], folded["b2"])

    def const_spec(arr, single_buffer):
        idx = lambda b, t, _n=arr.ndim: (0,) * _n
        if single_buffer:
            # Constant-index weight blocks: one pipeline buffer is enough (saves VMEM).
            return pl.BlockSpec(arr.shape, idx, pipeline_mode=pl.Buffered(1))
        return pl.BlockSpec(arr.shape, idx)

    def build(single_buffer):
        in_specs = [pl.BlockSpec((1, tile_t, C), lambda b, t: (b, t, 0))]
        in_specs += [const_spec(a, single_buffer) for a in weight_args]
        return pl.pallas_call(
            kern,
            out_shape=jax.ShapeDtypeStruct((B, T_pad, C), x.dtype),
            grid=(B, nt),
            in_specs=in_specs,
            out_specs=pl.BlockSpec((1, tile_t, C), lambda b, t: (b, t, 0)),
            scratch_shapes=[pltpu.VMEM((hist_rows, C), jnp.float32)],
            compiler_params=pltpu.CompilerParams(
                dimension_semantics=("parallel", "arbitrary"),
                vmem_limit_bytes=vmem_limit),
        )

    args = (x_in,) + weight_args
    try:
        out = build(True)(*args)
        out = jax.block_until_ready(out)
    except Exception:
        # pipeline_mode / pl.Buffered(1) not supported on this jax version: double-buffer.
        out = build(False)(*args)

    return out if T_pad == T else out[:, :T, :]


# ----------------------------------------------------------------------------------------
# Parameter folding, reference, init
# ----------------------------------------------------------------------------------------

def fold_params(p, matmul_dtype=jnp.bfloat16):
    """Fold LN gamma/beta into PW1 and BN scale into dw; cast matmul weights to bf16."""
    w1 = p["w1"].T                           # (C, 2C)  (x @ W form)
    w2 = p["w2"].T                           # (C, C)
    dw = p["dw"].T                           # (K, C)
    bn_s = p["bn_g"] / jnp.sqrt(p["bn_var"] + p["bn_eps"])
    bn_t = p["bn_b"] - p["bn_mean"] * bn_s
    w1_f = p["ln_g"][:, None] * w1           # fold LN gamma
    b1_f = p["ln_b"] @ w1 + p["b1"]          # fold LN beta
    dw_f = dw * bn_s[None, :]                # fold BN scale
    return dict(
        w1=w1_f.astype(matmul_dtype),
        b1=b1_f.reshape(1, -1).astype(jnp.float32),
        dw=dw_f.astype(jnp.float32),
        bn_t=bn_t.reshape(1, -1).astype(jnp.float32),
        w2=w2.astype(matmul_dtype),
        b2=p["b2"].reshape(1, -1).astype(jnp.float32),
    )


def reference(x, p, kernel_size):
    """Pure-JAX f32 mirror of the PyTorch forward (eval mode)."""
    K = kernel_size
    C = x.shape[-1]
    mu = jnp.mean(x, -1, keepdims=True)
    var = jnp.mean((x - mu) ** 2, -1, keepdims=True)
    xn = (x - mu) / jnp.sqrt(var + 1e-5) * p["ln_g"] + p["ln_b"]
    pre = xn @ p["w1"].T + p["b1"]
    a, g = pre[..., :C], pre[..., C:]
    glu = a * jax.nn.sigmoid(g)
    T = glu.shape[1]
    padded = jnp.pad(glu, ((0, 0), (K - 1, 0), (0, 0)))
    dwt = p["dw"].T                                           # (K, C)
    y = sum(padded[:, j:j + T, :] * dwt[j] for j in range(K))
    bn_s = p["bn_g"] / jnp.sqrt(p["bn_var"] + p["bn_eps"])
    bn_t = p["bn_b"] - p["bn_mean"] * bn_s
    y = y * bn_s + bn_t
    y = y * jax.nn.sigmoid(y)
    return y @ p["w2"].T + p["b2"]


def init_params(key, in_channels, kernel_size, expansion_factor=2):
    """PyTorch-layout raw parameters (fresh-module BatchNorm running stats)."""
    C, K = in_channels, kernel_size
    ks = jax.random.split(key, 8)
    s = 0.2
    w1 = s * jax.random.normal(ks[0], (expansion_factor * C, C), jnp.float32)  # (2C, C, 1) squeezed
    b1 = s * jax.random.normal(ks[1], (expansion_factor * C,), jnp.float32)
    dw = s * jax.random.normal(ks[2], (C, K), jnp.float32)                     # (C, 1, K) squeezed
    w2 = s * jax.random.normal(ks[3], (C, C), jnp.float32)
    b2 = s * jax.random.normal(ks[4], (C,), jnp.float32)
    ln_g = 1.0 + s * jax.random.normal(ks[5], (C,), jnp.float32)
    ln_b = s * jax.random.normal(ks[6], (C,), jnp.float32)
    bn_g = 1.0 + s * jax.random.normal(ks[7], (C,), jnp.float32)
    return dict(
        w1=w1, b1=b1, dw=dw, w2=w2, b2=b2,
        ln_g=ln_g, ln_b=ln_b,
        bn_g=bn_g, bn_b=jnp.zeros((C,), jnp.float32),
        bn_mean=jnp.zeros((C,), jnp.float32), bn_var=jnp.ones((C,), jnp.float32),
        bn_eps=1e-5,
    )


if __name__ == "__main__":
    B, C = 2, 8
    KERNEL_SIZE = 7                 # must be odd (same as the PyTorch assertion)

    key = jax.random.PRNGKey(0)
    kx1, kx2, kp = jax.random.split(key, 3)
    raw = init_params(kp, C, KERNEL_SIZE)
    folded = fold_params(raw)

    # Test 1: tile_t=8 -> two sequential time tiles with the carried causal halo (n_sub=1).
    T1 = 16
    x1 = jax.random.normal(kx1, (B, T1, C), jnp.float32)       # (batch, time, dim)
    out1 = jax.block_until_ready(
        conformer_conv_module(x1, folded, kernel_size=KERNEL_SIZE, tile_t=8))
    ref1 = reference(x1, raw, KERNEL_SIZE)
    assert out1.shape == (B, T1, C)
    err1 = float(jnp.max(jnp.abs(out1 - ref1)))
    assert jnp.allclose(out1, ref1, atol=3e-2, rtol=3e-2), f"test1 max abs err {err1}"

    # Test 2: non-divisor T (host-padded tail), two sub-chunks per tile (MXU/VPU overlap),
    # roll-based causal windows, inter-tile AND intra-tile halo handoff.
    T2 = 19
    x2 = jax.random.normal(kx2, (B, T2, C), jnp.float32)
    out2 = jax.block_until_ready(
        conformer_conv_module(x2, folded, kernel_size=KERNEL_SIZE, tile_t=16))
    ref2 = reference(x2, raw, KERNEL_SIZE)
    assert out2.shape == (B, T2, C)
    err2 = float(jnp.max(jnp.abs(out2 - ref2)))
    assert jnp.allclose(out2, ref2, atol=3e-2, rtol=3e-2), f"test2 max abs err {err2}"

    # Test 3: bf16 activations in / bf16 out (halved HBM traffic); structural checks only.
    out3 = jax.block_until_ready(
        conformer_conv_module(x2.astype(jnp.bfloat16), folded,
                              kernel_size=KERNEL_SIZE, tile_t=16))
    assert out3.shape == (B, T2, C) and out3.dtype == jnp.bfloat16
    assert bool(jnp.all(jnp.isfinite(out3.astype(jnp.float32))))

    print("KERNEL_OK")
</pallas_src>

<mosaic_0001>
module attributes {stable_mosaic.version = 11 : i64} {
  func.func @conformer_conv_kernel(%arg0: i32, %arg1: i32, %arg2: memref<1x8x8xf32, #tpu.memory_space<vmem>>, %arg3: memref<8x16xbf16, #tpu.memory_space<vmem>>, %arg4: memref<1x16xf32, #tpu.memory_space<vmem>>, %arg5: memref<7x8xf32, #tpu.memory_space<vmem>>, %arg6: memref<1x8xf32, #tpu.memory_space<vmem>>, %arg7: memref<8x8xbf16, #tpu.memory_space<vmem>>, %arg8: memref<1x8xf32, #tpu.memory_space<vmem>>, %arg9: memref<1x8x8xf32, #tpu.memory_space<vmem>>, %arg10: memref<8x8xf32, #tpu.memory_space<vmem>>) attributes {dimension_semantics = [#tpu.dimension_semantics<parallel>, #tpu.dimension_semantics<arbitrary>], iteration_bounds = array<i64: 2, 2>, scalar_prefetch = 0 : i64, scratch_operands = 1 : i64, tpu.core_type = #tpu.core_type<tc>, window_params = [{transform_indices = @transform_0, window_bounds = array<i64: 1, 8, 8>}, {pipeline_mode = #tpu.pipeline_mode<synchronous>, transform_indices = @transform_1, window_bounds = array<i64: 8, 16>}, {pipeline_mode = #tpu.pipeline_mode<synchronous>, transform_indices = @transform_2, window_bounds = array<i64: 1, 16>}, {pipeline_mode = #tpu.pipeline_mode<synchronous>, transform_indices = @transform_3, window_bounds = array<i64: 7, 8>}, {pipeline_mode = #tpu.pipeline_mode<synchronous>, transform_indices = @transform_4, window_bounds = array<i64: 1, 8>}, {pipeline_mode = #tpu.pipeline_mode<synchronous>, transform_indices = @transform_5, window_bounds = array<i64: 8, 8>}, {pipeline_mode = #tpu.pipeline_mode<synchronous>, transform_indices = @transform_6, window_bounds = array<i64: 1, 8>}, {transform_indices = @transform_7, window_bounds = array<i64: 1, 8, 8>}]} {
    %c0_i32 = arith.constant 0 : i32
    %0 = arith.cmpi eq, %arg1, %c0_i32 : i32
    %1 = arith.extui %0 : i1 to i32
    %c0_i32_0 = arith.constant 0 : i32
    %2 = arith.cmpi ne, %1, %c0_i32_0 : i32
    scf.if %2 {
      %cst_30 = arith.constant 0.000000e+00 : f32
      %110 = vector.broadcast %cst_30 : f32 to vector<8x8xf32>
      %c0_31 = arith.constant 0 : index
      %c0_32 = arith.constant 0 : index
      %111 = vector.load %arg10[%c0_31, %c0_32] : memref<8x8xf32, #tpu.memory_space<vmem>>, vector<8x8xf32>
      tpu.vector_store %arg10[%c0_31, %c0_32], %110 {strides = array<i32>} : memref<8x8xf32, #tpu.memory_space<vmem>>, vector<8x8xf32>,
    } else {
    }
    %c0 = arith.constant 0 : index
    %c0_1 = arith.constant 0 : index
    %3 = vector.load %arg3[%c0, %c0_1] : memref<8x16xbf16, #tpu.memory_space<vmem>>, vector<8x16xbf16>
    %c0_2 = arith.constant 0 : index
    %c0_3 = arith.constant 0 : index
    %4 = vector.load %arg4[%c0_2, %c0_3] : memref<1x16xf32, #tpu.memory_space<vmem>>, vector<1x16xf32>
    %5 = vector.shape_cast %4 : vector<1x16xf32> to vector<16xf32>
    %c0_4 = arith.constant 0 : index
    %c0_5 = arith.constant 0 : index
    %6 = vector.load %arg5[%c0_4, %c0_5] : memref<7x8xf32, #tpu.memory_space<vmem>>, vector<7x8xf32>
    %c0_6 = arith.constant 0 : index
    %c0_7 = arith.constant 0 : index
    %7 = vector.load %arg6[%c0_6, %c0_7] : memref<1x8xf32, #tpu.memory_space<vmem>>, vector<1x8xf32>
    %8 = vector.shape_cast %7 : vector<1x8xf32> to vector<8xf32>
    %c0_8 = arith.constant 0 : index
    %c0_9 = arith.constant 0 : index
    %9 = vector.load %arg7[%c0_8, %c0_9] : memref<8x8xbf16, #tpu.memory_space<vmem>>, vector<8x8xbf16>
    %c0_10 = arith.constant 0 : index
    %c0_11 = arith.constant 0 : index
    %10 = vector.load %arg8[%c0_10, %c0_11] : memref<1x8xf32, #tpu.memory_space<vmem>>, vector<1x8xf32>
    %11 = vector.shape_cast %10 : vector<1x8xf32> to vector<8xf32>
    %c0_12 = arith.constant 0 : index
    %c0_13 = arith.constant 0 : index
    %12 = vector.load %arg10[%c0_12, %c0_13] : memref<8x8xf32, #tpu.memory_space<vmem>>, vector<8x8xf32>
    %c0_14 = arith.constant 0 : index
    %c0_15 = arith.constant 0 : index
    %c0_16 = arith.constant 0 : index
    %13 = vector.load %arg2[%c0_14, %c0_15, %c0_16] : memref<1x8x8xf32, #tpu.memory_space<vmem>>, vector<1x8x8xf32>
    %14 = vector.shape_cast %13 : vector<1x8x8xf32> to vector<8x8xf32>
    %cst = arith.constant dense<0.000000e+00> : vector<8xf32>
    %15 = vector.multi_reduction <add>, %14, %cst [1] : vector<8x8xf32> to vector<8xf32>
    %16 = vector.shape_cast %15 : vector<8xf32> to vector<8x1xf32>
    %cst_17 = arith.constant 8.000000e+00 : f32
    %17 = vector.broadcast %cst_17 : f32 to vector<8x1xf32>
    %18 = arith.divf %16, %17 : vector<8x1xf32>
    %19 = vector.broadcast %18 : vector<8x1xf32> to vector<8x8xf32>
    %20 = arith.subf %14, %19 : vector<8x8xf32>
    %21 = arith.mulf %20, %20 : vector<8x8xf32>
    %cst_18 = arith.constant dense<0.000000e+00> : vector<8xf32>
    %22 = vector.multi_reduction <add>, %21, %cst_18 [1] : vector<8x8xf32> to vector<8xf32>
    %23 = vector.shape_cast %22 : vector<8xf32> to vector<8x1xf32>
    %cst_19 = arith.constant 8.000000e+00 : f32
    %24 = vector.broadcast %cst_19 : f32 to vector<8x1xf32>
    %25 = arith.divf %23, %24 : vector<8x1xf32>
    %cst_20 = arith.constant 9.99999974E-6 : f32
    %26 = vector.broadcast %cst_20 : f32 to vector<8x1xf32>
    %27 = arith.addf %25, %26 : vector<8x1xf32>
    %28 = math.rsqrt %27 : vector<8x1xf32>
    %29 = vector.broadcast %28 : vector<8x1xf32> to vector<8x8xf32>
    %30 = arith.mulf %20, %29 : vector<8x8xf32>
    %31 = arith.truncf %30 : vector<8x8xf32> to vector<8x8xbf16>
    %cst_21 = arith.constant dense<0.000000e+00> : vector<8x16xf32>
    %32 = tpu.matmul %31, %3, %cst_21 {dimension_numbers = #tpu.dot_dimension_numbers<[1], [0], [0], [1], [0, 0, 1, 1], [], []>} : vector<8x8xbf16>, vector<8x16xbf16>, vector<8x16xf32> -> vector<8x16xf32>
    %33 = vector.shape_cast %5 : vector<16xf32> to vector<1x16xf32>
    %34 = vector.broadcast %33 : vector<1x16xf32> to vector<8x16xf32>
    %35 = arith.addf %32, %34 : vector<8x16xf32>
    %36 = vector.extract_strided_slice %35 {offsets = [0, 0], sizes = [8, 8], strides = [1, 1]} : vector<8x16xf32> to vector<8x8xf32>
    %37 = vector.extract_strided_slice %35 {offsets = [0, 8], sizes = [8, 8], strides = [1, 1]} : vector<8x16xf32> to vector<8x8xf32>
    %38 = arith.negf %37 : vector<8x8xf32>
    %39 = math.exp %38 : vector<8x8xf32>
    %cst_22 = arith.constant 1.000000e+00 : f32
    %40 = vector.broadcast %cst_22 : f32 to vector<8x8xf32>
    %41 = arith.addf %40, %39 : vector<8x8xf32>
    %42 = arith.divf %40, %41 : vector<8x8xf32>
    %43 = arith.mulf %36, %42 : vector<8x8xf32>
    %44 = tpu.concatenate %12, %43 in 0 : vector<8x8xf32>, vector<8x8xf32> -> vector<16x8xf32>
    %45 = vector.extract_strided_slice %44 {offsets = [2, 0], sizes = [8, 8], strides = [1, 1]} : vector<16x8xf32> to vector<8x8xf32>
    %46 = vector.extract_strided_slice %6 {offsets = [0, 0], sizes = [1, 8], strides = [1, 1]} : vector<7x8xf32> to vector<1x8xf32>
    %47 = vector.shape_cast %46 : vector<1x8xf32> to vector<8xf32>
    %48 = vector.shape_cast %47 : vector<8xf32> to vector<1x8xf32>
    %49 = vector.broadcast %48 : vector<1x8xf32> to vector<8x8xf32>
    %50 = arith.mulf %45, %49 : vector<8x8xf32>
    %51 = vector.shape_cast %8 : vector<8xf32> to vector<1x8xf32>
    %52 = vector.broadcast %51 : vector<1x8xf32> to vector<8x8xf32>
    %53 = arith.addf %52, %50 : vector<8x8xf32>
    %54 = vector.extract_strided_slice %44 {offsets = [3, 0], sizes = [8, 8], strides = [1, 1]} : vector<16x8xf32> to vector<8x8xf32>
    %55 = vector.extract_strided_slice %6 {offsets = [1, 0], sizes = [1, 8], strides = [1, 1]} : vector<7x8xf32> to vector<1x8xf32>
    %56 = vector.shape_cast %55 : vector<1x8xf32> to vector<8xf32>
    %57 = vector.shape_cast %56 : vector<8xf32> to vector<1x8xf32>
    %58 = vector.broadcast %57 : vector<1x8xf32> to vector<8x8xf32>
    %59 = arith.mulf %54, %58 : vector<8x8xf32>
    %60 = arith.addf %53, %59 : vector<8x8xf32>
    %61 = vector.extract_strided_slice %44 {offsets = [4, 0], sizes = [8, 8], strides = [1, 1]} : vector<16x8xf32> to vector<8x8xf32>
    %62 = vector.extract_strided_slice %6 {offsets = [2, 0], sizes = [1, 8], strides = [1, 1]} : vector<7x8xf32> to vector<1x8xf32>
    %63 = vector.shape_cast %62 : vector<1x8xf32> to vector<8xf32>
    %64 = vector.shape_cast %63 : vector<8xf32> to vector<1x8xf32>
    %65 = vector.broadcast %64 : vector<1x8xf32> to vector<8x8xf32>
    %66 = arith.mulf %61, %65 : vector<8x8xf32>
    %67 = arith.addf %60, %66 : vector<8x8xf32>
    %68 = vector.extract_strided_slice %44 {offsets = [5, 0], sizes = [8, 8], strides = [1, 1]} : vector<16x8xf32> to vector<8x8xf32>
    %69 = vector.extract_strided_slice %6 {offsets = [3, 0], sizes = [1, 8], strides = [1, 1]} : vector<7x8xf32> to vector<1x8xf32>
    %70 = vector.shape_cast %69 : vector<1x8xf32> to vector<8xf32>
    %71 = vector.shape_cast %70 : vector<8xf32> to vector<1x8xf32>
    %72 = vector.broadcast %71 : vector<1x8xf32> to vector<8x8xf32>
    %73 = arith.mulf %68, %72 : vector<8x8xf32>
    %74 = arith.addf %67, %73 : vector<8x8xf32>
    %75 = vector.extract_strided_slice %44 {offsets = [6, 0], sizes = [8, 8], strides = [1, 1]} : vector<16x8xf32> to vector<8x8xf32>
    %76 = vector.extract_strided_slice %6 {offsets = [4, 0], sizes = [1, 8], strides = [1, 1]} : vector<7x8xf32> to vector<1x8xf32>
    %77 = vector.shape_cast %76 : vector<1x8xf32> to vector<8xf32>
    %78 = vector.shape_cast %77 : vector<8xf32> to vector<1x8xf32>
    %79 = vector.broadcast %78 : vector<1x8xf32> to vector<8x8xf32>
    %80 = arith.mulf %75, %79 : vector<8x8xf32>
    %81 = arith.addf %74, %80 : vector<8x8xf32>
    %82 = vector.extract_strided_slice %44 {offsets = [7, 0], sizes = [8, 8], strides = [1, 1]} : vector<16x8xf32> to vector<8x8xf32>
    %83 = vector.extract_strided_slice %6 {offsets = [5, 0], sizes = [1, 8], strides = [1, 1]} : vector<7x8xf32> to vector<1x8xf32>
    %84 = vector.shape_cast %83 : vector<1x8xf32> to vector<8xf32>
    %85 = vector.shape_cast %84 : vector<8xf32> to vector<1x8xf32>
    %86 = vector.broadcast %85 : vector<1x8xf32> to vector<8x8xf32>
    %87 = arith.mulf %82, %86 : vector<8x8xf32>
    %88 = arith.addf %81, %87 : vector<8x8xf32>
    %89 = vector.extract_strided_slice %6 {offsets = [6, 0], sizes = [1, 8], strides = [1, 1]} : vector<7x8xf32> to vector<1x8xf32>
    %90 = vector.shape_cast %89 : vector<1x8xf32> to vector<8xf32>
    %91 = vector.shape_cast %90 : vector<8xf32> to vector<1x8xf32>
    %92 = vector.broadcast %91 : vector<1x8xf32> to vector<8x8xf32>
    %93 = arith.mulf %43, %92 : vector<8x8xf32>
    %94 = arith.addf %88, %93 : vector<8x8xf32>
    %95 = arith.negf %94 : vector<8x8xf32>
    %96 = math.exp %95 : vector<8x8xf32>
    %cst_23 = arith.constant 1.000000e+00 : f32
    %97 = vector.broadcast %cst_23 : f32 to vector<8x8xf32>
    %98 = arith.addf %97, %96 : vector<8x8xf32>
    %99 = arith.divf %97, %98 : vector<8x8xf32>
    %100 = arith.mulf %94, %99 : vector<8x8xf32>
    %101 = arith.truncf %100 : vector<8x8xf32> to vector<8x8xbf16>
    %cst_24 = arith.constant dense<0.000000e+00> : vector<8x8xf32>
    %102 = tpu.matmul %101, %9, %cst_24 {dimension_numbers = #tpu.dot_dimension_numbers<[1], [0], [0], [1], [0, 0, 1, 1], [], []>} : vector<8x8xbf16>, vector<8x8xbf16>, vector<8x8xf32> -> vector<8x8xf32>
    %103 = vector.shape_cast %11 : vector<8xf32> to vector<1x8xf32>
    %104 = vector.broadcast %103 : vector<1x8xf32> to vector<8x8xf32>
    %105 = arith.addf %102, %104 : vector<8x8xf32>
    %c0_25 = arith.constant 0 : index
    %c0_26 = arith.constant 0 : index
    %c0_27 = arith.constant 0 : index
    %106 = vector.load %arg9[%c0_25, %c0_26, %c0_27] : memref<1x8x8xf32, #tpu.memory_space<vmem>>, vector<1x8x8xf32>
    %107 = vector.shape_cast %106 : vector<1x8x8xf32> to vector<8x8xf32>
    %108 = vector.shape_cast %105 : vector<8x8xf32> to vector<1x8x8xf32>
    tpu.vector_store %arg9[%c0_25, %c0_26, %c0_27], %108 {strides = array<i32>} : memref<1x8x8xf32, #tpu.memory_space<vmem>>, vector<1x8x8xf32>,
    %c0_28 = arith.constant 0 : index
    %c0_29 = arith.constant 0 : index
    %109 = vector.load %arg10[%c0_28, %c0_29] : memref<8x8xf32, #tpu.memory_space<vmem>>, vector<8x8xf32>
    tpu.vector_store %arg10[%c0_28, %c0_29], %43 {strides = array<i32>} : memref<8x8xf32, #tpu.memory_space<vmem>>, vector<8x8xf32>,
    return
  }
  func.func @transform_0(%arg0: i32, %arg1: i32) -> (i32, i32, i32) {
    %c0_i32 = arith.constant 0 : i32
    %c0_i32_0 = arith.constant 0 : i32
    return %arg0, %arg1, %c0_i32 : i32, i32, i32
  }
  func.func @transform_1(%arg0: i32, %arg1: i32) -> (i32, i32) {
    %c0_i32 = arith.constant 0 : i32
    %c0_i32_0 = arith.constant 0 : i32
    %c0_i32_1 = arith.constant 0 : i32
    return %c0_i32, %c0_i32_0 : i32, i32
  }
  func.func @transform_2(%arg0: i32, %arg1: i32) -> (i32, i32) {
    %c0_i32 = arith.constant 0 : i32
    %c0_i32_0 = arith.constant 0 : i32
    %c0_i32_1 = arith.constant 0 : i32
    return %c0_i32, %c0_i32_0 : i32, i32
  }
  func.func @transform_3(%arg0: i32, %arg1: i32) -> (i32, i32) {
    %c0_i32 = arith.constant 0 : i32
    %c0_i32_0 = arith.constant 0 : i32
    %c0_i32_1 = arith.constant 0 : i32
    return %c0_i32, %c0_i32_0 : i32, i32
  }
  func.func @transform_4(%arg0: i32, %arg1: i32) -> (i32, i32) {
    %c0_i32 = arith.constant 0 : i32
    %c0_i32_0 = arith.constant 0 : i32
    %c0_i32_1 = arith.constant 0 : i32
    return %c0_i32, %c0_i32_0 : i32, i32
  }
  func.func @transform_5(%arg0: i32, %arg1: i32) -> (i32, i32) {
    %c0_i32 = arith.constant 0 : i32
    %c0_i32_0 = arith.constant 0 : i32
    %c0_i32_1 = arith.constant 0 : i32
    return %c0_i32, %c0_i32_0 : i32, i32
  }
  func.func @transform_6(%arg0: i32, %arg1: i32) -> (i32, i32) {
    %c0_i32 = arith.constant 0 : i32
    %c0_i32_0 = arith.constant 0 : i32
    %c0_i32_1 = arith.constant 0 : i32
    return %c0_i32, %c0_i32_0 : i32, i32
  }
  func.func @transform_7(%arg0: i32, %arg1: i32) -> (i32, i32, i32) {
    %c0_i32 = arith.constant 0 : i32
    %c0_i32_0 = arith.constant 0 : i32
    return %arg0, %arg1, %c0_i32 : i32, i32, i32
  }
}

module attributes {stable_mosaic.version = 11 : i64} {
  func.func @conformer_conv_kernel(%arg0: i32, %arg1: i32, %arg2: memref<1x8x8xf32, #tpu.memory_space<vmem>>, %arg3: memref<8x16xbf16, #tpu.memory_space<vmem>>, %arg4: memref<1x16xf32, #tpu.memory_space<vmem>>, %arg5: memref<7x8xf32, #tpu.memory_space<vmem>>, %arg6: memref<1x8xf32, #tpu.memory_space<vmem>>, %arg7: memref<8x8xbf16, #tpu.memory_space<vmem>>, %arg8: memref<1x8xf32, #tpu.memory_space<vmem>>, %arg9: memref<1x8x8xf32, #tpu.memory_space<vmem>>, %arg10: memref<8x8xf32, #tpu.memory_space<vmem>>) attributes {dimension_semantics = [#tpu.dimension_semantics<parallel>, #tpu.dimension_semantics<arbitrary>], iteration_bounds = array<i64: 2, 2>, scalar_prefetch = 0 : i64, scratch_operands = 1 : i64, tpu.core_type = #tpu.core_type<tc>, window_params = [{transform_indices = @transform_0, window_bounds = array<i64: 1, 8, 8>}, {pipeline_mode = #tpu.pipeline_mode<synchronous>, transform_indices = @transform_1, window_bounds = array<i64: 8, 16>}, {pipeline_mode = #tpu.pipeline_mode<synchronous>, transform_indices = @transform_2, window_bounds = array<i64: 1, 16>}, {pipeline_mode = #tpu.pipeline_mode<synchronous>, transform_indices = @transform_3, window_bounds = array<i64: 7, 8>}, {pipeline_mode = #tpu.pipeline_mode<synchronous>, transform_indices = @transform_4, window_bounds = array<i64: 1, 8>}, {pipeline_mode = #tpu.pipeline_mode<synchronous>, transform_indices = @transform_5, window_bounds = array<i64: 8, 8>}, {pipeline_mode = #tpu.pipeline_mode<synchronous>, transform_indices = @transform_6, window_bounds = array<i64: 1, 8>}, {transform_indices = @transform_7, window_bounds = array<i64: 1, 8, 8>}]} {
    %c0_i32 = arith.constant 0 : i32
    %0 = arith.cmpi eq, %arg1, %c0_i32 : i32
    %1 = arith.extui %0 : i1 to i32
    %c0_i32_0 = arith.constant 0 : i32
    %2 = arith.cmpi ne, %1, %c0_i32_0 : i32
    scf.if %2 {
      %cst_30 = arith.constant 0.000000e+00 : f32
      %110 = vector.broadcast %cst_30 : f32 to vector<8x8xf32>
      %c0_31 = arith.constant 0 : index
      %c0_32 = arith.constant 0 : index
      %111 = vector.load %arg10[%c0_31, %c0_32] : memref<8x8xf32, #tpu.memory_space<vmem>>, vector<8x8xf32>
      tpu.vector_store %arg10[%c0_31, %c0_32], %110 {strides = array<i32>} : memref<8x8xf32, #tpu.memory_space<vmem>>, vector<8x8xf32>,
    } else {
    }
    %c0 = arith.constant 0 : index
    %c0_1 = arith.constant 0 : index
    %3 = vector.load %arg3[%c0, %c0_1] : memref<8x16xbf16, #tpu.memory_space<vmem>>, vector<8x16xbf16>
    %c0_2 = arith.constant 0 : index
    %c0_3 = arith.constant 0 : index
    %4 = vector.load %arg4[%c0_2, %c0_3] : memref<1x16xf32, #tpu.memory_space<vmem>>, vector<1x16xf32>
    %5 = vector.shape_cast %4 : vector<1x16xf32> to vector<16xf32>
    %c0_4 = arith.constant 0 : index
    %c0_5 = arith.constant 0 : index
    %6 = vector.load %arg5[%c0_4, %c0_5] : memref<7x8xf32, #tpu.memory_space<vmem>>, vector<7x8xf32>
    %c0_6 = arith.constant 0 : index
    %c0_7 = arith.constant 0 : index
    %7 = vector.load %arg6[%c0_6, %c0_7] : memref<1x8xf32, #tpu.memory_space<vmem>>, vector<1x8xf32>
    %8 = vector.shape_cast %7 : vector<1x8xf32> to vector<8xf32>
    %c0_8 = arith.constant 0 : index
    %c0_9 = arith.constant 0 : index
    %9 = vector.load %arg7[%c0_8, %c0_9] : memref<8x8xbf16, #tpu.memory_space<vmem>>, vector<8x8xbf16>
    %c0_10 = arith.constant 0 : index
    %c0_11 = arith.constant 0 : index
    %10 = vector.load %arg8[%c0_10, %c0_11] : memref<1x8xf32, #tpu.memory_space<vmem>>, vector<1x8xf32>
    %11 = vector.shape_cast %10 : vector<1x8xf32> to vector<8xf32>
    %c0_12 = arith.constant 0 : index
    %c0_13 = arith.constant 0 : index
    %12 = vector.load %arg10[%c0_12, %c0_13] : memref<8x8xf32, #tpu.memory_space<vmem>>, vector<8x8xf32>
    %c0_14 = arith.constant 0 : index
    %c0_15 = arith.constant 0 : index
    %c0_16 = arith.constant 0 : index
    %13 = vector.load %arg2[%c0_14, %c0_15, %c0_16] : memref<1x8x8xf32, #tpu.memory_space<vmem>>, vector<1x8x8xf32>
    %14 = vector.shape_cast %13 : vector<1x8x8xf32> to vector<8x8xf32>
    %cst = arith.constant dense<0.000000e+00> : vector<8xf32>
    %15 = vector.multi_reduction <add>, %14, %cst [1] : vector<8x8xf32> to vector<8xf32>
    %16 = vector.shape_cast %15 : vector<8xf32> to vector<8x1xf32>
    %cst_17 = arith.constant 8.000000e+00 : f32
    %17 = vector.broadcast %cst_17 : f32 to vector<8x1xf32>
    %18 = arith.divf %16, %17 : vector<8x1xf32>
    %19 = vector.broadcast %18 : vector<8x1xf32> to vector<8x8xf32>
    %20 = arith.subf %14, %19 : vector<8x8xf32>
    %21 = arith.mulf %20, %20 : vector<8x8xf32>
    %cst_18 = arith.constant dense<0.000000e+00> : vector<8xf32>
    %22 = vector.multi_reduction <add>, %21, %cst_18 [1] : vector<8x8xf32> to vector<8xf32>
    %23 = vector.shape_cast %22 : vector<8xf32> to vector<8x1xf32>
    %cst_19 = arith.constant 8.000000e+00 : f32
    %24 = vector.broadcast %cst_19 : f32 to vector<8x1xf32>
    %25 = arith.divf %23, %24 : vector<8x1xf32>
    %cst_20 = arith.constant 9.99999974E-6 : f32
    %26 = vector.broadcast %cst_20 : f32 to vector<8x1xf32>
    %27 = arith.addf %25, %26 : vector<8x1xf32>
    %28 = math.rsqrt %27 : vector<8x1xf32>
    %29 = vector.broadcast %28 : vector<8x1xf32> to vector<8x8xf32>
    %30 = arith.mulf %20, %29 : vector<8x8xf32>
    %31 = arith.truncf %30 : vector<8x8xf32> to vector<8x8xbf16>
    %cst_21 = arith.constant dense<0.000000e+00> : vector<8x16xf32>
    %32 = tpu.matmul %31, %3, %cst_21 {dimension_numbers = #tpu.dot_dimension_numbers<[1], [0], [0], [1], [0, 0, 1, 1], [], []>} : vector<8x8xbf16>, vector<8x16xbf16>, vector<8x16xf32> -> vector<8x16xf32>
    %33 = vector.shape_cast %5 : vector<16xf32> to vector<1x16xf32>
    %34 = vector.broadcast %33 : vector<1x16xf32> to vector<8x16xf32>
    %35 = arith.addf %32, %34 : vector<8x16xf32>
    %36 = vector.extract_strided_slice %35 {offsets = [0, 0], sizes = [8, 8], strides = [1, 1]} : vector<8x16xf32> to vector<8x8xf32>
    %37 = vector.extract_strided_slice %35 {offsets = [0, 8], sizes = [8, 8], strides = [1, 1]} : vector<8x16xf32> to vector<8x8xf32>
    %38 = arith.negf %37 : vector<8x8xf32>
    %39 = math.exp %38 : vector<8x8xf32>
    %cst_22 = arith.constant 1.000000e+00 : f32
    %40 = vector.broadcast %cst_22 : f32 to vector<8x8xf32>
    %41 = arith.addf %40, %39 : vector<8x8xf32>
    %42 = arith.divf %40, %41 : vector<8x8xf32>
    %43 = arith.mulf %36, %42 : vector<8x8xf32>
    %44 = tpu.concatenate %12, %43 in 0 : vector<8x8xf32>, vector<8x8xf32> -> vector<16x8xf32>
    %45 = vector.extract_strided_slice %44 {offsets = [2, 0], sizes = [8, 8], strides = [1, 1]} : vector<16x8xf32> to vector<8x8xf32>
    %46 = vector.extract_strided_slice %6 {offsets = [0, 0], sizes = [1, 8], strides = [1, 1]} : vector<7x8xf32> to vector<1x8xf32>
    %47 = vector.shape_cast %46 : vector<1x8xf32> to vector<8xf32>
    %48 = vector.shape_cast %47 : vector<8xf32> to vector<1x8xf32>
    %49 = vector.broadcast %48 : vector<1x8xf32> to vector<8x8xf32>
    %50 = arith.mulf %45, %49 : vector<8x8xf32>
    %51 = vector.shape_cast %8 : vector<8xf32> to vector<1x8xf32>
    %52 = vector.broadcast %51 : vector<1x8xf32> to vector<8x8xf32>
    %53 = arith.addf %52, %50 : vector<8x8xf32>
    %54 = vector.extract_strided_slice %44 {offsets = [3, 0], sizes = [8, 8], strides = [1, 1]} : vector<16x8xf32> to vector<8x8xf32>
    %55 = vector.extract_strided_slice %6 {offsets = [1, 0], sizes = [1, 8], strides = [1, 1]} : vector<7x8xf32> to vector<1x8xf32>
    %56 = vector.shape_cast %55 : vector<1x8xf32> to vector<8xf32>
    %57 = vector.shape_cast %56 : vector<8xf32> to vector<1x8xf32>
    %58 = vector.broadcast %57 : vector<1x8xf32> to vector<8x8xf32>
    %59 = arith.mulf %54, %58 : vector<8x8xf32>
    %60 = arith.addf %53, %59 : vector<8x8xf32>
    %61 = vector.extract_strided_slice %44 {offsets = [4, 0], sizes = [8, 8], strides = [1, 1]} : vector<16x8xf32> to vector<8x8xf32>
    %62 = vector.extract_strided_slice %6 {offsets = [2, 0], sizes = [1, 8], strides = [1, 1]} : vector<7x8xf32> to vector<1x8xf32>
    %63 = vector.shape_cast %62 : vector<1x8xf32> to vector<8xf32>
    %64 = vector.shape_cast %63 : vector<8xf32> to vector<1x8xf32>
    %65 = vector.broadcast %64 : vector<1x8xf32> to vector<8x8xf32>
    %66 = arith.mulf %61, %65 : vector<8x8xf32>
    %67 = arith.addf %60, %66 : vector<8x8xf32>
    %68 = vector.extract_strided_slice %44 {offsets = [5, 0], sizes = [8, 8], strides = [1, 1]} : vector<16x8xf32> to vector<8x8xf32>
    %69 = vector.extract_strided_slice %6 {offsets = [3, 0], sizes = [1, 8], strides = [1, 1]} : vector<7x8xf32> to vector<1x8xf32>
    %70 = vector.shape_cast %69 : vector<1x8xf32> to vector<8xf32>
    %71 = vector.shape_cast %70 : vector<8xf32> to vector<1x8xf32>
    %72 = vector.broadcast %71 : vector<1x8xf32> to vector<8x8xf32>
    %73 = arith.mulf %68, %72 : vector<8x8xf32>
    %74 = arith.addf %67, %73 : vector<8x8xf32>
    %75 = vector.extract_strided_slice %44 {offsets = [6, 0], sizes = [8, 8], strides = [1, 1]} : vector<16x8xf32> to vector<8x8xf32>
    %76 = vector.extract_strided_slice %6 {offsets = [4, 0], sizes = [1, 8], strides = [1, 1]} : vector<7x8xf32> to vector<1x8xf32>
    %77 = vector.shape_cast %76 : vector<1x8xf32> to vector<8xf32>
    %78 = vector.shape_cast %77 : vector<8xf32> to vector<1x8xf32>
    %79 = vector.broadcast %78 : vector<1x8xf32> to vector<8x8xf32>
    %80 = arith.mulf %75, %79 : vector<8x8xf32>
    %81 = arith.addf %74, %80 : vector<8x8xf32>
    %82 = vector.extract_strided_slice %44 {offsets = [7, 0], sizes = [8, 8], strides = [1, 1]} : vector<16x8xf32> to vector<8x8xf32>
    %83 = vector.extract_strided_slice %6 {offsets = [5, 0], sizes = [1, 8], strides = [1, 1]} : vector<7x8xf32> to vector<1x8xf32>
    %84 = vector.shape_cast %83 : vector<1x8xf32> to vector<8xf32>
    %85 = vector.shape_cast %84 : vector<8xf32> to vector<1x8xf32>
    %86 = vector.broadcast %85 : vector<1x8xf32> to vector<8x8xf32>
    %87 = arith.mulf %82, %86 : vector<8x8xf32>
    %88 = arith.addf %81, %87 : vector<8x8xf32>
    %89 = vector.extract_strided_slice %6 {offsets = [6, 0], sizes = [1, 8], strides = [1, 1]} : vector<7x8xf32> to vector<1x8xf32>
    %90 = vector.shape_cast %89 : vector<1x8xf32> to vector<8xf32>
    %91 = vector.shape_cast %90 : vector<8xf32> to vector<1x8xf32>
    %92 = vector.broadcast %91 : vector<1x8xf32> to vector<8x8xf32>
    %93 = arith.mulf %43, %92 : vector<8x8xf32>
    %94 = arith.addf %88, %93 : vector<8x8xf32>
    %95 = arith.negf %94 : vector<8x8xf32>
    %96 = math.exp %95 : vector<8x8xf32>
    %cst_23 = arith.constant 1.000000e+00 : f32
    %97 = vector.broadcast %cst_23 : f32 to vector<8x8xf32>
    %98 = arith.addf %97, %96 : vector<8x8xf32>
    %99 = arith.divf %97, %98 : vector<8x8xf32>
    %100 = arith.mulf %94, %99 : vector<8x8xf32>
    %101 = arith.truncf %100 : vector<8x8xf32> to vector<8x8xbf16>
    %cst_24 = arith.constant dense<0.000000e+00> : vector<8x8xf32>
    %102 = tpu.matmul %101, %9, %cst_24 {dimension_numbers = #tpu.dot_dimension_numbers<[1], [0], [0], [1], [0, 0, 1, 1], [], []>} : vector<8x8xbf16>, vector<8x8xbf16>, vector<8x8xf32> -> vector<8x8xf32>
    %103 = vector.shape_cast %11 : vector<8xf32> to vector<1x8xf32>
    %104 = vector.broadcast %103 : vector<1x8xf32> to vector<8x8xf32>
    %105 = arith.addf %102, %104 : vector<8x8xf32>
    %c0_25 = arith.constant 0 : index
    %c0_26 = arith.constant 0 : index
    %c0_27 = arith.constant 0 : index
    %106 = vector.load %arg9[%c0_25, %c0_26, %c0_27] : memref<1x8x8xf32, #tpu.memory_space<vmem>>, vector<1x8x8xf32>
    %107 = vector.shape_cast %106 : vector<1x8x8xf32> to vector<8x8xf32>
    %108 = vector.shape_cast %105 : vector<8x8xf32> to vector<1x8x8xf32>
    tpu.vector_store %arg9[%c0_25, %c0_26, %c0_27], %108 {strides = array<i32>} : memref<1x8x8xf32, #tpu.memory_space<vmem>>, vector<1x8x8xf32>,
    %c0_28 = arith.constant 0 : index
    %c0_29 = arith.constant 0 : index
    %109 = vector.load %arg10[%c0_28, %c0_29] : memref<8x8xf32, #tpu.memory_space<vmem>>, vector<8x8xf32>
    tpu.vector_store %arg10[%c0_28, %c0_29], %43 {strides = array<i32>} : memref<8x8xf32, #tpu.memory_space<vmem>>, vector<8x8xf32>,
    return
  }
  func.func @transform_0(%arg0: i32, %arg1: i32) -> (i32, i32, i32) {
    %c0_i32 = arith.constant 0 : i32
    %c0_i32_0 = arith.constant 0 : i32
    return %arg0, %arg1, %c0_i32 : i32, i32, i32
  }
  func.func @transform_1(%arg0: i32, %arg1: i32) -> (i32, i32) {
    %c0_i32 = arith.constant 0 : i32
    %c0_i32_0 = arith.constant 0 : i32
    %c0_i32_1 = arith.constant 0 : i32
    return %c0_i32, %c0_i32_0 : i32, i32
  }
  func.func @transform_2(%arg0: i32, %arg1: i32) -> (i32, i32) {
    %c0_i32 = arith.constant 0 : i32
    %c0_i32_0 = arith.constant 0 : i32
    %c0_i32_1 = arith.constant 0 : i32
    return %c0_i32, %c0_i32_0 : i32, i32
  }
  func.func @transform_3(%arg0: i32, %arg1: i32) -> (i32, i32) {
    %c0_i32 = arith.constant 0 : i32
    %c0_i32_0 = arith.constant 0 : i32
    %c0_i32_1 = arith.constant 0 : i32
    return %c0_i32, %c0_i32_0 : i32, i32
  }
  func.func @transform_4(%arg0: i32, %arg1: i32) -> (i32, i32) {
    %c0_i32 = arith.constant 0 : i32
    %c0_i32_0 = arith.constant 0 : i32
    %c0_i32_1 = arith.constant 0 : i32
    return %c0_i32, %c0_i32_0 : i32, i32
  }
  func.func @transform_5(%arg0: i32, %arg1: i32) -> (i32, i32) {
    %c0_i32 = arith.constant 0 : i32
    %c0_i32_0 = arith.constant 0 : i32
    %c0_i32_1 = arith.constant 0 : i32
    return %c0_i32, %c0_i32_0 : i32, i32
  }
  func.func @transform_6(%arg0: i32, %arg1: i32) -> (i32, i32) {
    %c0_i32 = arith.constant 0 : i32
    %c0_i32_0 = arith.constant 0 : i32
    %c0_i32_1 = arith.constant 0 : i32
    return %c0_i32, %c0_i32_0 : i32, i32
  }
  func.func @transform_7(%arg0: i32, %arg1: i32) -> (i32, i32, i32) {
    %c0_i32 = arith.constant 0 : i32
    %c0_i32_0 = arith.constant 0 : i32
    return %arg0, %arg1, %c0_i32 : i32, i32, i32
  }
}

</mosaic_0001>

<bundles_post_ra>
// kernel: tpu_custom_call.1
= control target key start
LH: loop header
LB: loop body
LE: loop exit
PB: predicated region body
PF: predicated region fallthrough
CT: control target
= control target key end

     0   :  { %s843_s24 = smov 0   ;;  %s845_s25 = smov 0   ;;  %s924_s0 = inlined_call_operand.vmem [shape: f32[2,16,8], index: 0, kind: input, shape index: {}]   ;;  %s925_s1 = inlined_call_operand.vmem [shape: bf16[8,16], index: 1, kind: input, shape index: {}]   ;;  %s926_s2 = inlined_call_operand.vmem [shape: f32[1,16], index: 2, kind: input, shape index: {}]   ;;  %s927_s3 = inlined_call_operand.vmem [shape: f32[7,8], index: 3, kind: input, shape index: {}]   ;;  %s928_s4 = inlined_call_operand.vmem [shape: f32[1,8], index: 4, kind: input, shape index: {}]   ;;  %s929_s5 = inlined_call_operand.vmem [shape: bf16[8,8], index: 5, kind: input, shape index: {}]   ;;  %s930_s6 = inlined_call_operand.vmem [shape: f32[1,8], index: 6, kind: input, shape index: {}]   ;;  %s931_s7 = inlined_call_operand.vmem [shape: f32[2,16,8], index: 7, kind: output, shape index: {}]  }
   0x1   :  { %s847_s26 = smov 0   ;;  %s849_s27 = smov 0  }
   0x2   :  { %s851_s28 = smov 0  }
   0x3 LB: > { %s26_s29 = sadd.s32 1, %s789_s26  ;;  %s29_s30 = sadd.s32 1, %s793_s27  ;;  %s797_s28 = sphi %s851_s28, %s17_s28   ;;  %s793_s27 = sphi %s849_s27, %s935_s27   ;;  %s789_s26 = sphi %s847_s26, %s934_s26   ;;  %s785_s25 = sphi %s845_s25, %s933_s25   ;;  %s781_s24 = sphi %s843_s24, %s932_s24  }
   0x4   : > { %p27_p0 = scmp.ge.s32.totalorder %s26_s29, 2  ;;  %p669_p1 = scmp.ge.s32.totalorder %s797_s28, 1 }
   0x5   : > { %p256_p2 = scmp.lt.s32.totalorder %s797_s28, 5 }
   0x6   : > { %s937_s29 = smov (%p27_p0, %s26_s29), 0  ;;  %s939_s30 = smov (!%p27_p0, %s29_s30), %s793_s27 }
   0x7   : > { %p257_p3 = pnand %p669_p1, %p256_p2  ;;  %p31_p4 = scmp.ge.s32.totalorder %s939_s30, 2 }
   0x8   : > { %p294_p5 = scmp.lt.s32.totalorder (!%p257_p3), %s785_s25, 1  ;;  %p296_p6 = scmp.lt.s32.totalorder (!%p257_p3), %s781_s24, 1 }
   0x9   : > { %s941_s30 = smov (%p31_p4, %s939_s30), 0  ;;  %260 = sbr.rel (%p257_p3) target bundleno = 956 (0x3bc), region = 48 }
   0xa   : > { %p674_p7 = scmp.ne.s32.totalorder (!%p257_p3), %s781_s24, 0 }
  0x10   : > { %s943_s25 = smov (!%p294_p5, %s785_s25), 1  ;;  %314 = sbr.rel (%p674_p7) target bundleno = 23 (0x17), region = 52 }
  0x11   : > { %s297_s8 = scalar_select %p296_p6, %s781_s24, 1 }
  0x12   : > { %s670_s9 = sshll.u32 %s943_s25, 1  ;;  %vm315_vm0 = vcmask (!%p674_p7), 64512   ;;  %v799_v0 = vmov (!%p674_p7), 0.0  }
  0x13   : > { %s299_s10 = sadd.s32 %s670_s9, %s297_s8  ;;  %316 = vst.msk [vmem:[#allocation2] sm:$0xff] (!%p674_p7), %vm315_vm0, %v799_v0 }
  0x14   : > { %s671_s11 = sshll.u32 %s299_s10, 3 }
  0x15   : > { %s301_s14 = scalar_lea.vmem %s924_s0, %s671_s11  ;;  %s879_s17 = scalar_lea.vmem %s931_s7, %s671_s11 }
  0x17 PF: > { %v324_v1 = vld [vmem:[%s301_s14] sm:$0xff]  ;;  %vm325_vm1 = vcmask 64512   ;;  %vm350_vm2 = vcmask 1043456   ;;  %v800_v9 = vmov 0.0   ;;  %vm801_vm3 = vmmov 0   ;;  %s802_s24 = smov 120  }
  0x18   : > { %v326_v2 = vsel %vm325_vm1, %v324_v1, 0.0  ;;  %v317_v8 = vld [vmem:[%s925_s1] sm:$0xf]  ;;  %689 = vmatprep.subr.bf16.mxu0 %v800_v9  ;;  %691 = vmatprep.mubr.msk.bf16.mxu0 %vm801_vm3, %v800_v9  ;;  %v405_v29 = vlaneseq  ;;  %vm427_vm4 = vcmask 1046528   ;;  %vm443_vm5 = vcmask 1045504  }
  0x19   : > { %327 = vadd.xlane.f32.xlu0 %v326_v2  ;;  %v352_v10 = vsel %vm350_vm2, %v317_v8, 0  ;;  %695 = vmatprep.subr.bf16.mxu1 %v800_v9  ;;  %v675_v17 = vld [vmem:[%s926_s2] ss:$0 sm:$0xff]  ;;  %vm459_vm6 = vcmask 1044480   ;;  %vm490_vm7 = vcmask 1042432  }
  0x1a   : > { %690 = vmatpush3.bf16.msra.mxu0 %v352_v10  ;;  %697 = vmatprep.mubr.msk.bf16.mxu1 %vm801_vm3, %v800_v9  ;;  %v321_v26 = vld [vmem:[%s929_s5] sm:$0xf]  ;;  %v406_v30 = vshrl.u32 %v405_v29, 7 }
  0x1b   : > { %v535_v27 = vsel %vm350_vm2, %v321_v26, 0  ;;  %v319_v32 = vld [vmem:[%s927_s3] sm:$0x7f] }
  0x1c   : > { %696 = vmatpush3.bf16.msra.mxu1 %v535_v27  ;;  %v421_v31 = vsub.s32 1, %v406_v30  ;;  %v407_v33 = vsub.s32 0, %v406_v30  ;;  %v437_v34 = vsub.s32 2, %v406_v30  ;;  %v453_v36 = vsub.s32 3, %v406_v30  ;;  %v323_v37 = vld [vmem:[#allocation2] sm:$0xff] }
  0x1d   : > { %v469_v40 = vsub.s32 4, %v406_v30  ;;  %v484_v43 = vsub.s32 5, %v406_v30  ;;  %v678_v49 = vld [vmem:[%s928_s4] ss:$0 sm:$0xff]  ;;  %v500_v53 = vsub.s32 6, %v406_v30 }
  0x1e   : > { %v422_v35 = vrot.slane %v319_v32, %v421_v31  ;;  %v408_v38 = vrot.slane %v319_v32, %v407_v33  ;;  %v438_v39 = vrot.slane %v319_v32, %v437_v34  ;;  %v454_v42 = vrot.slane %v319_v32, %v453_v36 }
  0x1f   : > { %v470_v47 = vrot.slane %v319_v32, %v469_v40  ;;  %v485_v52 = vrot.slane %v319_v32, %v484_v43 }
  0x20   : > { %v423_v41 = vmul.f32 %v422_v35, %v323_v37  ;;  %v409_v45 = vmul.f32 %v408_v38, %v323_v37  ;;  %v439_v46 = vmul.f32 %v438_v39, %v323_v37  ;;  %v455_v51 = vmul.f32 %v454_v42, %v323_v37 }
  0x21   : > { %v471_v60 = vmul.f32 %v470_v47, %v323_v37  ;;  %v486_v2 = vmul.f32 %v485_v52, %v323_v37 }
  0x22   : > { %v428_v50 = vrot.slane %v423_v41, 1  ;;  %v417_v58 = vadd.f32 %v678_v49, %v409_v45  ;;  %v444_v59 = vrot.slane %v439_v46, 2  ;;  %v681_v41 = vld [vmem:[%s930_s6] ss:$0 sm:$0xff] }
  0xa6   : > { %v328_v3 = vpop.xlane.xlu0 %327 }
  0xa7   : > { %v330_v4 = vmul.f32 0.125, %v328_v3  ;;  %v501_v3 = vrot.slane %v319_v32, %v500_v53 }
  0xa9   : > { %v331_v5 = vsub.f32 %v324_v1, %v330_v4  ;;  %v460_v1 = vrot.slane %v455_v51, 3 }
  0xab   : > { %v332_v6 = vmul.f32 %v331_v5, %v331_v5 }
  0xad   : > { %v333_v7 = vsel %vm325_vm1, %v332_v6, 0.0 }
  0xae   : > { %334 = vadd.xlane.f32.xlu0 %v333_v7 }
 0x13b   : > { %v335_v11 = vpop.xlane.xlu0 %334 }
 0x13c   : > { %v336_v12 = vmul.f32 0.125, %v335_v11  ;;  %v475_v11 = vrot.slane %v471_v60, 4 }
 0x13e   : > { %v337_v13 = vadd.f32 1e-05, %v336_v12 }
 0x140   : > { %745 = vrsqrt.f32 %v337_v13 }
 0x14a   : > { %v746_v14 = vpop.eup %745 }
 0x14b   : > { %v339_v15 = vmul.f32 %v746_v14, %v331_v5  ;;  %v491_v14 = vrot.slane %v486_v2, 5 }
 0x14d   : > { %v340_v16 = vpack.c.bf16 %v339_v15, %v339_v15 }
 0x14f   : > { %692 = vmatmul.mubr.msk.bf16.vlgmr.msra.gmra.mrb[0].mxu0 %vm325_vm1, %v340_v16 }
 0x222   : > { %v388_v18 = vpop.f32.mrb[0].mxu0 }
 0x223   : > { %v389_v19 = vadd.f32 %v675_v17, %v388_v18  ;;  %v693_v20 = vpop.f32.mrb[1].mxu0 }
 0x224   : > { %v391_v21 = vpop.f32.mrb[2].mxu0 }
 0x225   : > { %v677_v22 = vmul.f32 -1.442695, %v389_v19  ;;  %v694_v23 = vpop.f32.mrb[3].mxu0 }
 0x227   : > { %747 = vpow2.f32 %v677_v22 }
 0x231   : > { %v748_v24 = vpop.eup %747 }
 0x232   : > { %v397_v25 = vadd.f32 1.0, %v748_v24 }
 0x234   : > { %749 = vrcp.f32 %v397_v25 }
 0x23e   : > { %v750_v28 = vpop.eup %749 }
 0x23f   : > { %401 = vrot.lane.b32.xlu1 %v750_v28, %s802_s24 }
 0x2b1   : > { %v402_v44 = vpop.permute.xlu1 %401 }
 0x2b2   : > { %v404_v48 = vmul.f32 %v402_v44, %v389_v19 }
 0x2b4   : > { %v410_v54 = vmul.f32 %v408_v38, %v404_v48  ;;  %v424_v55 = vmul.f32 %v422_v35, %v404_v48  ;;  %v440_v56 = vmul.f32 %v438_v39, %v404_v48  ;;  %v456_v57 = vmul.f32 %v454_v42, %v404_v48  ;;  %578 = vst.msk [vmem:[#allocation2] sm:$0xff] %vm325_vm1, %v404_v48 }
 0x2b5   : > { %v472_v0 = vmul.f32 %v470_v47, %v404_v48  ;;  %v487_v7 = vmul.f32 %v485_v52, %v404_v48  ;;  %v502_v18 = vmul.f32 %v501_v3, %v404_v48 }
 0x2b6   : > { %v418_v61 = vadd.f32 %v678_v49, %v410_v54  ;;  %v429_v62 = vrot.slane %v424_v55, 1  ;;  %v445_v63 = vrot.slane %v440_v56, 2  ;;  %v461_v6 = vrot.slane %v456_v57, 3 }
 0x2b7   : > { %v476_v12 = vrot.slane %v472_v0, 4  ;;  %v492_v17 = vrot.slane %v487_v7, 5  ;;  %v504_v25 = vrot.slane %v502_v18, 6 }
 0x2b8   : > { %v430_v4 = vsel %vm427_vm4, %v428_v50, %v429_v62  ;;  %v434_v5 = vadd.f32 %v429_v62, %v418_v61  ;;  %v446_v9 = vsel %vm443_vm5, %v444_v59, %v445_v63  ;;  %v462_v15 = vsel %vm459_vm6, %v460_v1, %v461_v6 }
 0x2b9   : > { %v433_v8 = vadd.f32 %v430_v4, %v417_v58  ;;  %v477_v20 = vsel %vm350_vm2, %v475_v11, %v476_v12  ;;  %v493_v23 = vsel %vm490_vm7, %v491_v14, %v492_v17 }
 0x2ba   : > { %v450_v10 = vadd.f32 %v445_v63, %v434_v5 }
 0x2bb   : > { %v449_v13 = vadd.f32 %v446_v9, %v433_v8 }
 0x2bc   : > { %v466_v16 = vadd.f32 %v461_v6, %v450_v10 }
 0x2bd   : > { %v465_v19 = vadd.f32 %v462_v15, %v449_v13 }
 0x2be   : > { %v481_v21 = vadd.f32 %v476_v12, %v466_v16 }
 0x2bf   : > { %v480_v22 = vadd.f32 %v477_v20, %v465_v19 }
 0x2c0   : > { %v497_v24 = vadd.f32 %v492_v17, %v481_v21 }
 0x2c1   : > { %v496_v26 = vadd.f32 %v493_v23, %v480_v22 }
 0x2c2   : > { %v507_v27 = vadd.f32 %v504_v25, %v497_v24 }
 0x2c3   : > { %v506_v28 = vadd.f32 %v504_v25, %v496_v26 }
 0x2c4   : > { %v680_v29 = vmul.f32 -1.442695, %v507_v27 }
 0x2c5   : > { %v679_v30 = vmul.f32 -1.442695, %v506_v28 }
 0x2c6   : > { %751 = vpow2.f32 %v680_v29 }
 0x2c7   : > { %753 = vpow2.f32 %v679_v30 }
 0x2d0   : > { %v752_v31 = vpop.eup %751 }
 0x2d1   : > { %v754_v32 = vpop.eup %753  ;;  %v515_v33 = vadd.f32 1.0, %v752_v31 }
 0x2d2   : > { %v514_v34 = vadd.f32 1.0, %v754_v32 }
 0x2d3   : > { %755 = vrcp.f32 %v515_v33 }
 0x2d4   : > { %757 = vrcp.f32 %v514_v34 }
 0x2dd   : > { %v756_v35 = vpop.eup %755 }
 0x2de   : > { %v758_v36 = vpop.eup %757  ;;  %v521_v37 = vmul.f32 %v756_v35, %v507_v27 }
 0x2df   : > { %v520_v38 = vmul.f32 %v758_v36, %v506_v28 }
 0x2e1   : > { %v522_v39 = vpack.c.bf16 %v521_v37, %v520_v38 }
 0x2e3   : > { %v530_v40 = vrot.slane %v522_v39, 1 }
 0x2e5   : > { %698 = vmatmul.mubr.msk.bf16.vlgmr.msra.gmra.mrb[0].mxu1 %vm325_vm1, %v530_v40 }
 0x3b8   : > { %v571_v42 = vpop.f32.mrb[0].mxu1 }
 0x3b9   : > { %v572_v43 = vadd.f32 %v681_v41, %v571_v42  ;;  %v699_v44 = vpop.f32.mrb[1].mxu1 }
 0x3ba   : > { %v574_v45 = vpop.f32.mrb[2].mxu1 }
 0x3bb   : > { %577 = vst.msk [vmem:[%s879_s17] sm:$0xff] %vm325_vm1, %v572_v43  ;;  %v700_v46 = vpop.f32.mrb[3].mxu1 }
 0x3bc PF: > { %s17_s28 = sadd.s32 1, %s797_s28   ;;  %s932_s24 = smov %s789_s26 }
 0x3bd   : > { %p14_p8 = scmp.ge.s32.totalorder %s17_s28, 6   ;;  %s933_s25 = smov %s793_s27 }
 0x3be   : > { %s934_s26 = smov %s937_s29  ;;  %s935_s27 = smov %s941_s30 }
 0x3bf   :  { %16 = sbr.rel (!%p14_p8) target bundleno = 3 (0x3), region = 82 }

// kernel: tpu_custom_call.1
= control target key start
LH: loop header
LB: loop body
LE: loop exit
PB: predicated region body
PF: predicated region fallthrough
CT: control target
= control target key end

     0   :  { %s843_s24 = smov 0   ;;  %s845_s25 = smov 0   ;;  %s924_s0 = inlined_call_operand.vmem [shape: f32[2,16,8], index: 0, kind: input, shape index: {}]   ;;  %s925_s1 = inlined_call_operand.vmem [shape: bf16[8,16], index: 1, kind: input, shape index: {}]   ;;  %s926_s2 = inlined_call_operand.vmem [shape: f32[1,16], index: 2, kind: input, shape index: {}]   ;;  %s927_s3 = inlined_call_operand.vmem [shape: f32[7,8], index: 3, kind: input, shape index: {}]   ;;  %s928_s4 = inlined_call_operand.vmem [shape: f32[1,8], index: 4, kind: input, shape index: {}]   ;;  %s929_s5 = inlined_call_operand.vmem [shape: bf16[8,8], index: 5, kind: input, shape index: {}]   ;;  %s930_s6 = inlined_call_operand.vmem [shape: f32[1,8], index: 6, kind: input, shape index: {}]   ;;  %s931_s7 = inlined_call_operand.vmem [shape: f32[2,16,8], index: 7, kind: output, shape index: {}]  }
   0x1   :  { %s847_s26 = smov 0   ;;  %s849_s27 = smov 0  }
   0x2   :  { %s851_s28 = smov 0  }
   0x3 LB: > { %s26_s29 = sadd.s32 1, %s789_s26  ;;  %s29_s30 = sadd.s32 1, %s793_s27  ;;  %s797_s28 = sphi %s851_s28, %s17_s28   ;;  %s793_s27 = sphi %s849_s27, %s935_s27   ;;  %s789_s26 = sphi %s847_s26, %s934_s26   ;;  %s785_s25 = sphi %s845_s25, %s933_s25   ;;  %s781_s24 = sphi %s843_s24, %s932_s24  }
   0x4   : > { %p27_p0 = scmp.ge.s32.totalorder %s26_s29, 2  ;;  %p669_p1 = scmp.ge.s32.totalorder %s797_s28, 1 }
   0x5   : > { %p256_p2 = scmp.lt.s32.totalorder %s797_s28, 5 }
   0x6   : > { %s937_s29 = smov (%p27_p0, %s26_s29), 0  ;;  %s939_s30 = smov (!%p27_p0, %s29_s30), %s793_s27 }
   0x7   : > { %p257_p3 = pnand %p669_p1, %p256_p2  ;;  %p31_p4 = scmp.ge.s32.totalorder %s939_s30, 2 }
   0x8   : > { %p294_p5 = scmp.lt.s32.totalorder (!%p257_p3), %s785_s25, 1  ;;  %p296_p6 = scmp.lt.s32.totalorder (!%p257_p3), %s781_s24, 1 }
   0x9   : > { %s941_s30 = smov (%p31_p4, %s939_s30), 0  ;;  %260 = sbr.rel (%p257_p3) target bundleno = 956 (0x3bc), region = 48 }
   0xa   : > { %p674_p7 = scmp.ne.s32.totalorder (!%p257_p3), %s781_s24, 0 }
  0x10   : > { %s943_s25 = smov (!%p294_p5, %s785_s25), 1  ;;  %314 = sbr.rel (%p674_p7) target bundleno = 23 (0x17), region = 52 }
  0x11   : > { %s297_s8 = scalar_select %p296_p6, %s781_s24, 1 }
  0x12   : > { %s670_s9 = sshll.u32 %s943_s25, 1  ;;  %vm315_vm0 = vcmask (!%p674_p7), 64512   ;;  %v799_v0 = vmov (!%p674_p7), 0.0  }
  0x13   : > { %s299_s10 = sadd.s32 %s670_s9, %s297_s8  ;;  %316 = vst.msk [vmem:[#allocation2] sm:$0xff] (!%p674_p7), %vm315_vm0, %v799_v0 }
  0x14   : > { %s671_s11 = sshll.u32 %s299_s10, 3 }
  0x15   : > { %s301_s14 = scalar_lea.vmem %s924_s0, %s671_s11  ;;  %s879_s17 = scalar_lea.vmem %s931_s7, %s671_s11 }
  0x17 PF: > { %v324_v1 = vld [vmem:[%s301_s14] sm:$0xff]  ;;  %vm325_vm1 = vcmask 64512   ;;  %vm350_vm2 = vcmask 1043456   ;;  %v800_v9 = vmov 0.0   ;;  %vm801_vm3 = vmmov 0   ;;  %s802_s24 = smov 120  }
  0x18   : > { %v326_v2 = vsel %vm325_vm1, %v324_v1, 0.0  ;;  %v317_v8 = vld [vmem:[%s925_s1] sm:$0xf]  ;;  %689 = vmatprep.subr.bf16.mxu0 %v800_v9  ;;  %691 = vmatprep.mubr.msk.bf16.mxu0 %vm801_vm3, %v800_v9  ;;  %v405_v29 = vlaneseq  ;;  %vm427_vm4 = vcmask 1046528   ;;  %vm443_vm5 = vcmask 1045504  }
  0x19   : > { %327 = vadd.xlane.f32.xlu0 %v326_v2  ;;  %v352_v10 = vsel %vm350_vm2, %v317_v8, 0  ;;  %695 = vmatprep.subr.bf16.mxu1 %v800_v9  ;;  %v675_v17 = vld [vmem:[%s926_s2] ss:$0 sm:$0xff]  ;;  %vm459_vm6 = vcmask 1044480   ;;  %vm490_vm7 = vcmask 1042432  }
  0x1a   : > { %690 = vmatpush3.bf16.msra.mxu0 %v352_v10  ;;  %697 = vmatprep.mubr.msk.bf16.mxu1 %vm801_vm3, %v800_v9  ;;  %v321_v26 = vld [vmem:[%s929_s5] sm:$0xf]  ;;  %v406_v30 = vshrl.u32 %v405_v29, 7 }
  0x1b   : > { %v535_v27 = vsel %vm350_vm2, %v321_v26, 0  ;;  %v319_v32 = vld [vmem:[%s927_s3] sm:$0x7f] }
  0x1c   : > { %696 = vmatpush3.bf16.msra.mxu1 %v535_v27  ;;  %v421_v31 = vsub.s32 1, %v406_v30  ;;  %v407_v33 = vsub.s32 0, %v406_v30  ;;  %v437_v34 = vsub.s32 2, %v406_v30  ;;  %v453_v36 = vsub.s32 3, %v406_v30  ;;  %v323_v37 = vld [vmem:[#allocation2] sm:$0xff] }
  0x1d   : > { %v469_v40 = vsub.s32 4, %v406_v30  ;;  %v484_v43 = vsub.s32 5, %v406_v30  ;;  %v678_v49 = vld [vmem:[%s928_s4] ss:$0 sm:$0xff]  ;;  %v500_v53 = vsub.s32 6, %v406_v30 }
  0x1e   : > { %v422_v35 = vrot.slane %v319_v32, %v421_v31  ;;  %v408_v38 = vrot.slane %v319_v32, %v407_v33  ;;  %v438_v39 = vrot.slane %v319_v32, %v437_v34  ;;  %v454_v42 = vrot.slane %v319_v32, %v453_v36 }
  0x1f   : > { %v470_v47 = vrot.slane %v319_v32, %v469_v40  ;;  %v485_v52 = vrot.slane %v319_v32, %v484_v43 }
  0x20   : > { %v423_v41 = vmul.f32 %v422_v35, %v323_v37  ;;  %v409_v45 = vmul.f32 %v408_v38, %v323_v37  ;;  %v439_v46 = vmul.f32 %v438_v39, %v323_v37  ;;  %v455_v51 = vmul.f32 %v454_v42, %v323_v37 }
  0x21   : > { %v471_v60 = vmul.f32 %v470_v47, %v323_v37  ;;  %v486_v2 = vmul.f32 %v485_v52, %v323_v37 }
  0x22   : > { %v428_v50 = vrot.slane %v423_v41, 1  ;;  %v417_v58 = vadd.f32 %v678_v49, %v409_v45  ;;  %v444_v59 = vrot.slane %v439_v46, 2  ;;  %v681_v41 = vld [vmem:[%s930_s6] ss:$0 sm:$0xff] }
  0xa6   : > { %v328_v3 = vpop.xlane.xlu0 %327 }
  0xa7   : > { %v330_v4 = vmul.f32 0.125, %v328_v3  ;;  %v501_v3 = vrot.slane %v319_v32, %v500_v53 }
  0xa9   : > { %v331_v5 = vsub.f32 %v324_v1, %v330_v4  ;;  %v460_v1 = vrot.slane %v455_v51, 3 }
  0xab   : > { %v332_v6 = vmul.f32 %v331_v5, %v331_v5 }
  0xad   : > { %v333_v7 = vsel %vm325_vm1, %v332_v6, 0.0 }
  0xae   : > { %334 = vadd.xlane.f32.xlu0 %v333_v7 }
 0x13b   : > { %v335_v11 = vpop.xlane.xlu0 %334 }
 0x13c   : > { %v336_v12 = vmul.f32 0.125, %v335_v11  ;;  %v475_v11 = vrot.slane %v471_v60, 4 }
 0x13e   : > { %v337_v13 = vadd.f32 1e-05, %v336_v12 }
 0x140   : > { %745 = vrsqrt.f32 %v337_v13 }
 0x14a   : > { %v746_v14 = vpop.eup %745 }
 0x14b   : > { %v339_v15 = vmul.f32 %v746_v14, %v331_v5  ;;  %v491_v14 = vrot.slane %v486_v2, 5 }
 0x14d   : > { %v340_v16 = vpack.c.bf16 %v339_v15, %v339_v15 }
 0x14f   : > { %692 = vmatmul.mubr.msk.bf16.vlgmr.msra.gmra.mrb[0].mxu0 %vm325_vm1, %v340_v16 }
 0x222   : > { %v388_v18 = vpop.f32.mrb[0].mxu0 }
 0x223   : > { %v389_v19 = vadd.f32 %v675_v17, %v388_v18  ;;  %v693_v20 = vpop.f32.mrb[1].mxu0 }
 0x224   : > { %v391_v21 = vpop.f32.mrb[2].mxu0 }
 0x225   : > { %v677_v22 = vmul.f32 -1.442695, %v389_v19  ;;  %v694_v23 = vpop.f32.mrb[3].mxu0 }
 0x227   : > { %747 = vpow2.f32 %v677_v22 }
 0x231   : > { %v748_v24 = vpop.eup %747 }
 0x232   : > { %v397_v25 = vadd.f32 1.0, %v748_v24 }
 0x234   : > { %749 = vrcp.f32 %v397_v25 }
 0x23e   : > { %v750_v28 = vpop.eup %749 }
 0x23f   : > { %401 = vrot.lane.b32.xlu1 %v750_v28, %s802_s24 }
 0x2b1   : > { %v402_v44 = vpop.permute.xlu1 %401 }
 0x2b2   : > { %v404_v48 = vmul.f32 %v402_v44, %v389_v19 }
 0x2b4   : > { %v410_v54 = vmul.f32 %v408_v38, %v404_v48  ;;  %v424_v55 = vmul.f32 %v422_v35, %v404_v48  ;;  %v440_v56 = vmul.f32 %v438_v39, %v404_v48  ;;  %v456_v57 = vmul.f32 %v454_v42, %v404_v48  ;;  %578 = vst.msk [vmem:[#allocation2] sm:$0xff] %vm325_vm1, %v404_v48 }
 0x2b5   : > { %v472_v0 = vmul.f32 %v470_v47, %v404_v48  ;;  %v487_v7 = vmul.f32 %v485_v52, %v404_v48  ;;  %v502_v18 = vmul.f32 %v501_v3, %v404_v48 }
 0x2b6   : > { %v418_v61 = vadd.f32 %v678_v49, %v410_v54  ;;  %v429_v62 = vrot.slane %v424_v55, 1  ;;  %v445_v63 = vrot.slane %v440_v56, 2  ;;  %v461_v6 = vrot.slane %v456_v57, 3 }
 0x2b7   : > { %v476_v12 = vrot.slane %v472_v0, 4  ;;  %v492_v17 = vrot.slane %v487_v7, 5  ;;  %v504_v25 = vrot.slane %v502_v18, 6 }
 0x2b8   : > { %v430_v4 = vsel %vm427_vm4, %v428_v50, %v429_v62  ;;  %v434_v5 = vadd.f32 %v429_v62, %v418_v61  ;;  %v446_v9 = vsel %vm443_vm5, %v444_v59, %v445_v63  ;;  %v462_v15 = vsel %vm459_vm6, %v460_v1, %v461_v6 }
 0x2b9   : > { %v433_v8 = vadd.f32 %v430_v4, %v417_v58  ;;  %v477_v20 = vsel %vm350_vm2, %v475_v11, %v476_v12  ;;  %v493_v23 = vsel %vm490_vm7, %v491_v14, %v492_v17 }
 0x2ba   : > { %v450_v10 = vadd.f32 %v445_v63, %v434_v5 }
 0x2bb   : > { %v449_v13 = vadd.f32 %v446_v9, %v433_v8 }
 0x2bc   : > { %v466_v16 = vadd.f32 %v461_v6, %v450_v10 }
 0x2bd   : > { %v465_v19 = vadd.f32 %v462_v15, %v449_v13 }
 0x2be   : > { %v481_v21 = vadd.f32 %v476_v12, %v466_v16 }
 0x2bf   : > { %v480_v22 = vadd.f32 %v477_v20, %v465_v19 }
 0x2c0   : > { %v497_v24 = vadd.f32 %v492_v17, %v481_v21 }
 0x2c1   : > { %v496_v26 = vadd.f32 %v493_v23, %v480_v22 }
 0x2c2   : > { %v507_v27 = vadd.f32 %v504_v25, %v497_v24 }
 0x2c3   : > { %v506_v28 = vadd.f32 %v504_v25, %v496_v26 }
 0x2c4   : > { %v680_v29 = vmul.f32 -1.442695, %v507_v27 }
 0x2c5   : > { %v679_v30 = vmul.f32 -1.442695, %v506_v28 }
 0x2c6   : > { %751 = vpow2.f32 %v680_v29 }
 0x2c7   : > { %753 = vpow2.f32 %v679_v30 }
 0x2d0   : > { %v752_v31 = vpop.eup %751 }
 0x2d1   : > { %v754_v32 = vpop.eup %753  ;;  %v515_v33 = vadd.f32 1.0, %v752_v31 }
 0x2d2   : > { %v514_v34 = vadd.f32 1.0, %v754_v32 }
 0x2d3   : > { %755 = vrcp.f32 %v515_v33 }
 0x2d4   : > { %757 = vrcp.f32 %v514_v34 }
 0x2dd   : > { %v756_v35 = vpop.eup %755 }
 0x2de   : > { %v758_v36 = vpop.eup %757  ;;  %v521_v37 = vmul.f32 %v756_v35, %v507_v27 }
 0x2df   : > { %v520_v38 = vmul.f32 %v758_v36, %v506_v28 }
 0x2e1   : > { %v522_v39 = vpack.c.bf16 %v521_v37, %v520_v38 }
 0x2e3   : > { %v530_v40 = vrot.slane %v522_v39, 1 }
 0x2e5   : > { %698 = vmatmul.mubr.msk.bf16.vlgmr.msra.gmra.mrb[0].mxu1 %vm325_vm1, %v530_v40 }
 0x3b8   : > { %v571_v42 = vpop.f32.mrb[0].mxu1 }
 0x3b9   : > { %v572_v43 = vadd.f32 %v681_v41, %v571_v42  ;;  %v699_v44 = vpop.f32.mrb[1].mxu1 }
 0x3ba   : > { %v574_v45 = vpop.f32.mrb[2].mxu1 }
 0x3bb   : > { %577 = vst.msk [vmem:[%s879_s17] sm:$0xff] %vm325_vm1, %v572_v43  ;;  %v700_v46 = vpop.f32.mrb[3].mxu1 }
 0x3bc PF: > { %s17_s28 = sadd.s32 1, %s797_s28   ;;  %s932_s24 = smov %s789_s26 }
 0x3bd   : > { %p14_p8 = scmp.ge.s32.totalorder %s17_s28, 6   ;;  %s933_s25 = smov %s793_s27 }
 0x3be   : > { %s934_s26 = smov %s937_s29  ;;  %s935_s27 = smov %s941_s30 }
 0x3bf   :  { %16 = sbr.rel (!%p14_p8) target bundleno = 3 (0x3), region = 82 }

</bundles_post_ra>
